<compile_context>
chip_gen: v5e
topology: v5e:2x2
jax: 0.10.0
libtpu: 0.0.40
codegen_flags: <defaults>
</compile_context>

<pallas_src>
import jax
import jax.numpy as jnp
from jax.experimental import pallas as pl
from jax.experimental.pallas import tpu as pltpu

_LANE = 1024        # lane-dense last dim (multiple of 128) -> unmasked vst
_TILE_ROWS = 1024   # 1024 * 1024 * 4 B = 4 MiB per f32 block; 4 buffers = 16 MiB
_MIN_KERNEL_ROWS = 8  # below one (8, 1024) tile the kernel is pure overhead


def _identity_kernel(x_ref, o_ref):
    # Elementwise pass-through (the "compute" of the abstract base Encoding).
    o_ref[...] = x_ref[...]


@jax.jit
def _identity_encode_pallas(in_tensor: jax.Array) -> jax.Array:
    """Identity encoding via a tiled, lane-dense Pallas copy kernel.

    Only called on inputs whose flattened size is an exact multiple of _LANE
    and at least _MIN_KERNEL_ROWS * _LANE elements, so no padding or slicing
    is ever needed (reshapes below are free row-major bitcasts).
    """
    orig_shape = in_tensor.shape
    total = in_tensor.size
    rows = total // _LANE
    x2d = in_tensor.reshape(rows, _LANE)

    if rows <= _TILE_ROWS:
        tile_r = rows                     # single block == full array dims
        grid_r = 1
    else:
        tile_r = _TILE_ROWS               # partial last block handled by Pallas
        grid_r = pl.cdiv(rows, tile_r)

    itemsize = jnp.dtype(in_tensor.dtype).itemsize

    out2d = pl.pallas_call(
        _identity_kernel,
        out_shape=jax.ShapeDtypeStruct((rows, _LANE), in_tensor.dtype),
        grid=(grid_r,),
        in_specs=[pl.BlockSpec((tile_r, _LANE), lambda i: (i, 0))],
        out_specs=pl.BlockSpec((tile_r, _LANE), lambda i: (i, 0)),
        compiler_params=pltpu.CompilerParams(
            dimension_semantics=("parallel",),
            vmem_limit_bytes=32 * 1024 * 1024,
        ),
        cost_estimate=pl.CostEstimate(
            flops=0,
            transcendentals=0,
            bytes_accessed=2 * total * itemsize,
        ),
    )(x2d)

    return out2d.reshape(orig_shape)


def _identity_encode(in_tensor: jax.Array) -> jax.Array:
    """Dispatch: Pallas copy for lane-aligned bulk data, trivial fast path otherwise."""
    total = in_tensor.size
    # Fast path: the identity base class produces out == in exactly, so for
    # non-lane-aligned or sub-tile inputs skip the kernel entirely (avoids an
    # HBM round trip plus pad/slice traffic).
    if total == 0 or total % _LANE != 0 or (total // _LANE) < _MIN_KERNEL_ROWS:
        return in_tensor
    return _identity_encode_pallas(in_tensor)


class Encoding:
    """JAX/Pallas port of the abstract `Encoding` field component."""

    def __init__(self, in_dim: int) -> None:
        if in_dim <= 0:
            raise ValueError("Input dimension should be greater than zero")
        self.in_dim = in_dim
        self.out_dim = in_dim  # identity base-class realization

    def set_in_dim(self, in_dim: int) -> None:
        if in_dim <= 0:
            raise ValueError("Input dimension should be greater than zero")
        self.in_dim = in_dim

    def get_out_dim(self) -> int:
        if self.out_dim is None:
            raise ValueError("Output dimension has not been set")
        return self.out_dim

    def forward(self, in_tensor: jax.Array) -> jax.Array:
        assert in_tensor.shape[-1] == self.in_dim
        return _identity_encode(in_tensor)

    def __call__(self, in_tensor: jax.Array) -> jax.Array:
        return self.forward(in_tensor)


if __name__ == "__main__":
    key = jax.random.PRNGKey(0)
    k_small, k_big = jax.random.split(key)

    enc = Encoding(in_dim=4)

    # 1) Tiny input [*bs, in_dim]: batch=2, seq=8, in_dim=4 -> fast path.
    x_small = jax.random.normal(k_small, (2, 8, 4), dtype=jnp.float32)
    y_small = enc(x_small)
    jax.block_until_ready(y_small)
    assert y_small.shape == (2, 8, enc.get_out_dim())
    assert y_small.dtype == x_small.dtype
    assert bool(jnp.allclose(y_small, x_small))

    # 2) Bulk lane-aligned input (e.g. flattened ray samples): 4096 points x
    #    in_dim=4 -> 16384 elems = 16 x 1024 -> Pallas kernel path.
    x_big = jax.random.normal(k_big, (4096, 4), dtype=jnp.float32)
    y_big = enc(x_big)
    jax.block_until_ready(y_big)
    assert y_big.shape == (4096, enc.get_out_dim())
    assert y_big.dtype == x_big.dtype
    assert bool(jnp.allclose(y_big, x_big))

    print("KERNEL_OK")
</pallas_src>

<mosaic_0001>
module attributes {stable_mosaic.version = 11 : i64} {
  func.func @_identity_kernel(%arg0: i32, %arg1: memref<16x1024xf32, #tpu.memory_space<vmem>>, %arg2: memref<16x1024xf32, #tpu.memory_space<vmem>>) attributes {dimension_semantics = [#tpu.dimension_semantics<parallel>], iteration_bounds = array<i64: 1>, scalar_prefetch = 0 : i64, scratch_operands = 0 : i64, tpu.core_type = #tpu.core_type<tc>, window_params = [{transform_indices = @transform_0, window_bounds = array<i64: 16, 1024>}, {transform_indices = @transform_1, window_bounds = array<i64: 16, 1024>}]} {
    %c0 = arith.constant 0 : index
    %c0_0 = arith.constant 0 : index
    %0 = vector.load %arg1[%c0, %c0_0] : memref<16x1024xf32, #tpu.memory_space<vmem>>, vector<16x1024xf32>
    %c0_1 = arith.constant 0 : index
    %c0_2 = arith.constant 0 : index
    %1 = vector.load %arg2[%c0_1, %c0_2] : memref<16x1024xf32, #tpu.memory_space<vmem>>, vector<16x1024xf32>
    tpu.vector_store %arg2[%c0_1, %c0_2], %0 {strides = array<i32>} : memref<16x1024xf32, #tpu.memory_space<vmem>>, vector<16x1024xf32>,
    return
  }
  func.func @transform_0(%arg0: i32) -> (i32, i32) {
    %c0_i32 = arith.constant 0 : i32
    %c0_i32_0 = arith.constant 0 : i32
    return %arg0, %c0_i32 : i32, i32
  }
  func.func @transform_1(%arg0: i32) -> (i32, i32) {
    %c0_i32 = arith.constant 0 : i32
    %c0_i32_0 = arith.constant 0 : i32
    return %arg0, %c0_i32 : i32, i32
  }
}

</mosaic_0001>

<bundles_post_ra>
// kernel: _identity_encode_pallas.1
= control target key start
LH: loop header
LB: loop body
LE: loop exit
PB: predicated region body
PF: predicated region fallthrough
CT: control target
= control target key end

     0   :  { %s150_s0 = inlined_call_operand.vmem [shape: f32[16,1024], index: 0, kind: input, shape index: {}]   ;;  %s151_s1 = inlined_call_operand.vmem [shape: f32[16,1024], index: 1, kind: output, shape index: {}]  }
   0x1   :  { %v8_v0 = vld [vmem:[%s150_s0] sm:$0xff]  ;;  %v9_v1 = vld [vmem:[%s150_s0 + $0x8] sm:$0xff]  ;;  %v10_v2 = vld [vmem:[%s150_s0 + $0x10] sm:$0xff] }
   0x2   :  { %24 = vst [vmem:[%s151_s1] sm:$0xff] %v8_v0  ;;  %v11_v3 = vld [vmem:[%s150_s0 + $0x18] sm:$0xff]  ;;  %v12_v4 = vld [vmem:[%s150_s0 + $0x20] sm:$0xff]  ;;  %v13_v5 = vld [vmem:[%s150_s0 + $0x28] sm:$0xff] }
   0x3   :  { %25 = vst [vmem:[%s151_s1 + $0x8] sm:$0xff] %v9_v1  ;;  %v14_v6 = vld [vmem:[%s150_s0 + $0x30] sm:$0xff]  ;;  %v15_v7 = vld [vmem:[%s150_s0 + $0x38] sm:$0xff]  ;;  %v16_v8 = vld [vmem:[%s150_s0 + $0x40] sm:$0xff] }
   0x4   :  { %26 = vst [vmem:[%s151_s1 + $0x10] sm:$0xff] %v10_v2  ;;  %v17_v9 = vld [vmem:[%s150_s0 + $0x48] sm:$0xff]  ;;  %v18_v10 = vld [vmem:[%s150_s0 + $0x50] sm:$0xff]  ;;  %v19_v11 = vld [vmem:[%s150_s0 + $0x58] sm:$0xff] }
   0x5   :  { %27 = vst [vmem:[%s151_s1 + $0x18] sm:$0xff] %v11_v3  ;;  %v20_v12 = vld [vmem:[%s150_s0 + $0x60] sm:$0xff]  ;;  %v21_v13 = vld [vmem:[%s150_s0 + $0x68] sm:$0xff]  ;;  %v22_v14 = vld [vmem:[%s150_s0 + $0x70] sm:$0xff] }
   0x6   :  { %28 = vst [vmem:[%s151_s1 + $0x20] sm:$0xff] %v12_v4  ;;  %v23_v15 = vld [vmem:[%s150_s0 + $0x78] sm:$0xff] }
   0x7   :  { %29 = vst [vmem:[%s151_s1 + $0x28] sm:$0xff] %v13_v5 }
   0x8   :  { %30 = vst [vmem:[%s151_s1 + $0x30] sm:$0xff] %v14_v6 }
   0x9   :  { %31 = vst [vmem:[%s151_s1 + $0x38] sm:$0xff] %v15_v7 }
   0xa   :  { %32 = vst [vmem:[%s151_s1 + $0x40] sm:$0xff] %v16_v8 }
   0xb   :  { %33 = vst [vmem:[%s151_s1 + $0x48] sm:$0xff] %v17_v9 }
   0xc   :  { %34 = vst [vmem:[%s151_s1 + $0x50] sm:$0xff] %v18_v10 }
   0xd   :  { %35 = vst [vmem:[%s151_s1 + $0x58] sm:$0xff] %v19_v11 }
   0xe   :  { %36 = vst [vmem:[%s151_s1 + $0x60] sm:$0xff] %v20_v12 }
   0xf   :  { %37 = vst [vmem:[%s151_s1 + $0x68] sm:$0xff] %v21_v13 }
  0x10   :  { %38 = vst [vmem:[%s151_s1 + $0x70] sm:$0xff] %v22_v14 }
  0x11   :  { %39 = vst [vmem:[%s151_s1 + $0x78] sm:$0xff] %v23_v15 }

</bundles_post_ra>
